<compile_context>
chip_gen: v6e
topology: v6e:2x2x1
jax: 0.10.0
libtpu: 0.0.40
codegen_flags: <defaults>
</compile_context>

<pallas_src>
import functools

import jax
import jax.numpy as jnp
from jax import lax
from jax.experimental import pallas as pl
from jax.experimental.pallas import tpu as pltpu


# ----------------------------------------------------------------------------
# Per-generation config + tiling heuristics
# ----------------------------------------------------------------------------
def _tpu_config():
    """Return (vmem_limit_bytes, tensorcores_per_device) for the attached TPU."""
    kind = ""
    try:
        kind = str(jax.devices()[0].device_kind).lower()
    except Exception:
        pass
    # 2 TensorCores per device: v4 / v5p megacore, v7x.  v5e / v6e are 1-TC.
    two_tc = any(tag in kind for tag in ("v4", "v5p", "v7"))
    if "v7" in kind:
        vmem_limit = 32 * 1024 * 1024       # 64 MiB physical/TC -> stay modest
    elif two_tc:
        vmem_limit = 48 * 1024 * 1024
    else:
        vmem_limit = 64 * 1024 * 1024       # v5e/v6e: 128 MiB physical, raise scoped limit
    return vmem_limit, (2 if two_tc else 1)


def _choose_lane_tile(n, s, vmem_limit_bytes, num_cores):
    """Pick (TN, Np): lane-tile width and padded slab width for an (s, n) slab."""
    lane = 128
    # Per 128-lane group: x-in + y-out blocks double-buffered by the pipeline
    # (4x s*128*4B) plus ~3 fp32 (s, TN) temporaries inside the kernel body.
    bytes_per_group = 7 * s * 4 * lane
    budget = int(vmem_limit_bytes * 0.55)
    max_groups = max(1, budget // max(bytes_per_group, 1))

    total_groups = pl.cdiv(n, lane)
    aligned = (n % lane == 0)

    # Split across TensorCores only on 2-TC parts and only when the slab is
    # 128-aligned (so the split never forces an extra pad/slice HBM pass).
    want_steps = 2 if (num_cores >= 2 and aligned and total_groups >= 2) else 1

    if total_groups <= max_groups and want_steps == 1:
        return n, n                          # one full-width block, no padding

    groups = max(1, min(max_groups, pl.cdiv(total_groups, want_steps)))

    if aligned:
        # Prefer a tile width that divides the slab exactly (no pad / slice),
        # unless that would shrink the tile by more than 2x.
        g = groups
        while g > 1 and total_groups % g != 0:
            g -= 1
        if g >= max(1, groups // 2):
            groups = g

    tn = groups * lane
    return tn, pl.cdiv(n, tn) * tn


# ----------------------------------------------------------------------------
# Kernels   (blocks:  x/y: (S, TN),  w/b: (1, TN),  stats: (2, TN))
# ----------------------------------------------------------------------------
def _revin_norm_kernel(x_ref, w_ref, b_ref, y_ref, stats_ref,
                       *, eps, affine, subtract_last):
    x = x_ref[...].astype(jnp.float32)                   # (S, TN)

    # Single cross-sublane mean reduction; variance is always about the mean
    # (matches torch.var unbiased=False) even when subtract_last.
    mean = jnp.mean(x, axis=0, keepdims=True)            # (1, TN)
    center = x[-1:, :] if subtract_last else mean

    d = x - mean
    var = jnp.mean(d * d, axis=0, keepdims=True)         # population variance
    v = var + eps
    std = jnp.sqrt(v)                                    # stored statistic
    inv_std = lax.rsqrt(v)                               # EUP rsqrt, one op

    # Fold everything into one per-element FMA:  y = x * scale + shift
    if affine:
        w = w_ref[...].astype(jnp.float32)
        b = b_ref[...].astype(jnp.float32)
        scale = w * inv_std
        shift = b - center * scale
    else:
        scale = inv_std
        shift = -center * scale

    y_ref[...] = (x * scale + shift).astype(y_ref.dtype)
    stats_ref[0:1, :] = center.astype(stats_ref.dtype)   # row 0: mean / last
    stats_ref[1:2, :] = std.astype(stats_ref.dtype)      # row 1: stdev


def _revin_denorm_kernel(x_ref, stats_ref, w_ref, b_ref, y_ref, *, eps, affine):
    x = x_ref[...].astype(jnp.float32)                   # (S, TN)
    center = stats_ref[0:1, :].astype(jnp.float32)       # (1, TN)
    std = stats_ref[1:2, :].astype(jnp.float32)          # (1, TN)

    if affine:
        w = w_ref[...].astype(jnp.float32)
        b = b_ref[...].astype(jnp.float32)
        # x' = (x - b) / (w + eps^2) * std + center  ==  x*scale + shift
        scale = std * pl.reciprocal(w + eps * eps, approx=False)
        shift = center - b * scale
    else:
        scale = std
        shift = center

    y_ref[...] = (x * scale + shift).astype(y_ref.dtype)


# ----------------------------------------------------------------------------
# Wrapper
# ----------------------------------------------------------------------------
class RevINPallas:
    """Pallas RevIN. Stats are returned/passed explicitly (JAX is functional)
    instead of being stashed on `self` like the PyTorch module."""

    def __init__(self, num_features, eps=1e-5, affine=True, subtract_last=False,
                 dtype=jnp.float32):
        self.num_features = num_features
        self.eps = float(eps)
        self.affine = affine
        self.subtract_last = subtract_last
        # Identical init to nn.Parameter(torch.ones/zeros(F)).
        self.affine_weight = jnp.ones((num_features,), dtype=dtype)
        self.affine_bias = jnp.zeros((num_features,), dtype=dtype)
        self._vmem_limit, self._num_cores = _tpu_config()

    # ---- helpers -------------------------------------------------------------
    def _tiled_affine(self, batch, n, np_):
        w2 = jnp.tile(self.affine_weight.astype(jnp.float32), batch).reshape(1, n)
        b2 = jnp.tile(self.affine_bias.astype(jnp.float32), batch).reshape(1, n)
        if np_ != n:
            w2 = jnp.pad(w2, ((0, 0), (0, np_ - n)), constant_values=1.0)
            b2 = jnp.pad(b2, ((0, 0), (0, np_ - n)))
        return w2, b2

    # ---- slab-level API (no layout plumbing) ---------------------------------
    def norm_slab(self, x2, batch):
        """x2: (S, B*F) lane-dense slab -> (y2, stats2) with stats2: (2, B*F)."""
        S, N = x2.shape
        TN, Np = _choose_lane_tile(N, S, self._vmem_limit, self._num_cores)
        xp = x2 if Np == N else jnp.pad(x2, ((0, 0), (0, Np - N)))
        w2, b2 = self._tiled_affine(batch, N, Np)

        kernel = functools.partial(
            _revin_norm_kernel, eps=self.eps,
            affine=self.affine, subtract_last=self.subtract_last)

        y2, stats2 = pl.pallas_call(
            kernel,
            out_shape=(
                jax.ShapeDtypeStruct((S, Np), x2.dtype),
                jax.ShapeDtypeStruct((2, Np), jnp.float32),
            ),
            grid_spec=pltpu.PrefetchScalarGridSpec(
                num_scalar_prefetch=0,
                grid=(Np // TN,),
                in_specs=[
                    pl.BlockSpec((S, TN), lambda j: (0, j)),   # x slab
                    pl.BlockSpec((1, TN), lambda j: (0, j)),   # weight (per-instance tiled)
                    pl.BlockSpec((1, TN), lambda j: (0, j)),   # bias
                ],
                out_specs=[
                    pl.BlockSpec((S, TN), lambda j: (0, j)),   # y slab
                    pl.BlockSpec((2, TN), lambda j: (0, j)),   # stacked center/std
                ],
            ),
            compiler_params=pltpu.CompilerParams(
                dimension_semantics=("parallel",),
                vmem_limit_bytes=self._vmem_limit),
        )(xp, w2, b2)

        if Np != N:
            y2 = y2[:, :N]
            stats2 = stats2[:, :N]
        return y2, stats2

    def denorm_slab(self, x2, stats2, batch):
        S, N = x2.shape
        TN, Np = _choose_lane_tile(N, S, self._vmem_limit, self._num_cores)
        xp = x2 if Np == N else jnp.pad(x2, ((0, 0), (0, Np - N)))
        st = stats2 if Np == N else jnp.pad(stats2, ((0, 0), (0, Np - N)),
                                            constant_values=1.0)
        w2, b2 = self._tiled_affine(batch, N, Np)

        kernel = functools.partial(
            _revin_denorm_kernel, eps=self.eps, affine=self.affine)

        y2 = pl.pallas_call(
            kernel,
            out_shape=jax.ShapeDtypeStruct((S, Np), x2.dtype),
            grid_spec=pltpu.PrefetchScalarGridSpec(
                num_scalar_prefetch=0,
                grid=(Np // TN,),
                in_specs=[
                    pl.BlockSpec((S, TN), lambda j: (0, j)),   # x slab
                    pl.BlockSpec((2, TN), lambda j: (0, j)),   # stacked center/std
                    pl.BlockSpec((1, TN), lambda j: (0, j)),   # weight
                    pl.BlockSpec((1, TN), lambda j: (0, j)),   # bias
                ],
                out_specs=pl.BlockSpec((S, TN), lambda j: (0, j)),
            ),
            compiler_params=pltpu.CompilerParams(
                dimension_semantics=("parallel",),
                vmem_limit_bytes=self._vmem_limit),
        )(xp, st, w2, b2)

        return y2 if Np == N else y2[:, :N]

    # ---- (B, S, F) PyTorch-layout API ----------------------------------------
    def norm(self, x):
        B, S, F = x.shape
        x2 = jnp.transpose(x, (1, 0, 2)).reshape(S, B * F)
        y2, stats2 = self.norm_slab(x2, B)
        y = y2.reshape(S, B, F).transpose(1, 0, 2)
        center = stats2[0].reshape(B, 1, F)
        std = stats2[1].reshape(B, 1, F)
        return y, center, std

    def denorm(self, x, center, std):
        B, S, F = x.shape
        x2 = jnp.transpose(x, (1, 0, 2)).reshape(S, B * F)
        stats2 = jnp.stack([center.reshape(B * F), std.reshape(B * F)], axis=0)
        y2 = self.denorm_slab(x2, stats2, B)
        return y2.reshape(S, B, F).transpose(1, 0, 2)

    def __call__(self, x, mode, mean=None, std=None):
        if mode == "norm":
            return self.norm(x)
        elif mode == "denorm":
            return self.denorm(x, mean, std)
        else:
            raise NotImplementedError


# ----------------------------------------------------------------------------
# Pure-JAX reference (mirrors the PyTorch forward exactly)
# ----------------------------------------------------------------------------
def _ref_norm(x, w, b, eps, affine, subtract_last):
    mean = jnp.mean(x, axis=1, keepdims=True)
    var = jnp.var(x, axis=1, keepdims=True)          # population variance
    std = jnp.sqrt(var + eps)
    center = x[:, -1:, :] if subtract_last else mean
    y = (x - center) / std
    if affine:
        y = y * w + b
    return y, center, std


def _ref_denorm(x, center, std, w, b, eps, affine):
    if affine:
        x = x - b
        x = x / (w + eps * eps)
    x = x * std
    x = x + center
    return x


# ----------------------------------------------------------------------------
if __name__ == "__main__":
    key = jax.random.PRNGKey(0)
    B, S, F = 32, 48, 8                      # (batch, seq_len, features); B*F = 256
    x = jax.random.normal(key, (B, S, F), dtype=jnp.float32) * 3.0 + 1.5

    w = jnp.ones((1, 1, F), jnp.float32)
    b = jnp.zeros((1, 1, F), jnp.float32)

    for subtract_last in (False, True):
        revin = RevINPallas(num_features=F, eps=1e-5, affine=True,
                            subtract_last=subtract_last)

        y, center, std = revin(x, "norm")
        x_rec = revin(y, "denorm", mean=center, std=std)
        jax.block_until_ready((y, center, std, x_rec))

        y_ref, c_ref, s_ref = _ref_norm(x, w, b, revin.eps, True, subtract_last)
        x_rec_ref = _ref_denorm(y_ref, c_ref, s_ref, w, b, revin.eps, True)

        assert jnp.allclose(center, c_ref, atol=1e-5, rtol=1e-5)
        assert jnp.allclose(std, s_ref, atol=1e-5, rtol=1e-5)
        assert jnp.allclose(y, y_ref, atol=3e-5, rtol=3e-5)
        assert jnp.allclose(x_rec, x_rec_ref, atol=1e-4, rtol=1e-4)
        assert jnp.allclose(x_rec, x, atol=1e-4, rtol=1e-4)   # round-trip identity

    # Odd, non-128-aligned width exercises the padding-free full-width block path.
    B2, S2, F2 = 3, 20, 5
    x_small = jax.random.normal(jax.random.PRNGKey(1), (B2, S2, F2),
                                dtype=jnp.float32) * 0.7 - 0.2
    revin2 = RevINPallas(num_features=F2, affine=False)
    y_s, c_s, s_s = revin2(x_small, "norm")
    x_s_rec = revin2(y_s, "denorm", mean=c_s, std=s_s)
    jax.block_until_ready((y_s, x_s_rec))
    y_s_ref, c_s_ref, s_s_ref = _ref_norm(x_small, None, None, revin2.eps, False, False)
    assert jnp.allclose(y_s, y_s_ref, atol=3e-5, rtol=3e-5)
    assert jnp.allclose(s_s, s_s_ref, atol=1e-5, rtol=1e-5)
    assert jnp.allclose(x_s_rec, x_small, atol=1e-4, rtol=1e-4)

    print("KERNEL_OK")
</pallas_src>

<mosaic_0001>
module attributes {stable_mosaic.version = 11 : i64} {
  func.func @_revin_norm_kernel(%arg0: i32, %arg1: memref<48x256xf32, #tpu.memory_space<vmem>>, %arg2: memref<1x256xf32, #tpu.memory_space<vmem>>, %arg3: memref<1x256xf32, #tpu.memory_space<vmem>>, %arg4: memref<48x256xf32, #tpu.memory_space<vmem>>, %arg5: memref<2x256xf32, #tpu.memory_space<vmem>>) attributes {dimension_semantics = [#tpu.dimension_semantics<parallel>], iteration_bounds = array<i64: 1>, scalar_prefetch = 0 : i64, scratch_operands = 0 : i64, tpu.core_type = #tpu.core_type<tc>, window_params = [{transform_indices = @transform_0, window_bounds = array<i64: 48, 256>}, {transform_indices = @transform_1, window_bounds = array<i64: 1, 256>}, {transform_indices = @transform_2, window_bounds = array<i64: 1, 256>}, {transform_indices = @transform_3, window_bounds = array<i64: 48, 256>}, {transform_indices = @transform_4, window_bounds = array<i64: 2, 256>}]} {
    %c0 = arith.constant 0 : index
    %c0_0 = arith.constant 0 : index
    %0 = vector.load %arg1[%c0, %c0_0] : memref<48x256xf32, #tpu.memory_space<vmem>>, vector<48x256xf32>
    %cst = arith.constant dense<0.000000e+00> : vector<256xf32>
    %1 = vector.multi_reduction <add>, %0, %cst [0] : vector<48x256xf32> to vector<256xf32>
    %2 = vector.shape_cast %1 : vector<256xf32> to vector<1x256xf32>
    %cst_1 = arith.constant 4.800000e+01 : f32
    %3 = vector.broadcast %cst_1 : f32 to vector<1x256xf32>
    %4 = arith.divf %2, %3 : vector<1x256xf32>
    %5 = vector.broadcast %4 : vector<1x256xf32> to vector<48x256xf32>
    %6 = arith.subf %0, %5 : vector<48x256xf32>
    %7 = arith.mulf %6, %6 : vector<48x256xf32>
    %cst_2 = arith.constant dense<0.000000e+00> : vector<256xf32>
    %8 = vector.multi_reduction <add>, %7, %cst_2 [0] : vector<48x256xf32> to vector<256xf32>
    %9 = vector.shape_cast %8 : vector<256xf32> to vector<1x256xf32>
    %cst_3 = arith.constant 4.800000e+01 : f32
    %10 = vector.broadcast %cst_3 : f32 to vector<1x256xf32>
    %11 = arith.divf %9, %10 : vector<1x256xf32>
    %cst_4 = arith.constant 9.99999974E-6 : f32
    %12 = vector.broadcast %cst_4 : f32 to vector<1x256xf32>
    %13 = arith.addf %11, %12 : vector<1x256xf32>
    %14 = math.sqrt %13 : vector<1x256xf32>
    %15 = math.rsqrt %13 : vector<1x256xf32>
    %c0_5 = arith.constant 0 : index
    %c0_6 = arith.constant 0 : index
    %16 = vector.load %arg2[%c0_5, %c0_6] : memref<1x256xf32, #tpu.memory_space<vmem>>, vector<1x256xf32>
    %c0_7 = arith.constant 0 : index
    %c0_8 = arith.constant 0 : index
    %17 = vector.load %arg3[%c0_7, %c0_8] : memref<1x256xf32, #tpu.memory_space<vmem>>, vector<1x256xf32>
    %18 = arith.mulf %16, %15 : vector<1x256xf32>
    %19 = arith.mulf %4, %18 : vector<1x256xf32>
    %20 = arith.subf %17, %19 : vector<1x256xf32>
    %21 = vector.broadcast %18 : vector<1x256xf32> to vector<48x256xf32>
    %22 = arith.mulf %0, %21 : vector<48x256xf32>
    %23 = vector.broadcast %20 : vector<1x256xf32> to vector<48x256xf32>
    %24 = arith.addf %22, %23 : vector<48x256xf32>
    %c0_9 = arith.constant 0 : index
    %c0_10 = arith.constant 0 : index
    %25 = vector.load %arg4[%c0_9, %c0_10] : memref<48x256xf32, #tpu.memory_space<vmem>>, vector<48x256xf32>
    tpu.vector_store %arg4[%c0_9, %c0_10], %24 {strides = array<i32>} : memref<48x256xf32, #tpu.memory_space<vmem>>, vector<48x256xf32>,
    %c0_11 = arith.constant 0 : index
    %c0_12 = arith.constant 0 : index
    %26 = vector.load %arg5[%c0_11, %c0_12] : memref<2x256xf32, #tpu.memory_space<vmem>>, vector<1x256xf32>
    tpu.vector_store %arg5[%c0_11, %c0_12], %4 {strides = array<i32>} : memref<2x256xf32, #tpu.memory_space<vmem>>, vector<1x256xf32>,
    %c1 = arith.constant 1 : index
    %c0_13 = arith.constant 0 : index
    %27 = vector.load %arg5[%c1, %c0_13] : memref<2x256xf32, #tpu.memory_space<vmem>>, vector<1x256xf32>
    tpu.vector_store %arg5[%c1, %c0_13], %14 {strides = array<i32>} : memref<2x256xf32, #tpu.memory_space<vmem>>, vector<1x256xf32>,
    return
  }
  func.func @transform_0(%arg0: i32) -> (i32, i32) {
    %c0_i32 = arith.constant 0 : i32
    %c0_i32_0 = arith.constant 0 : i32
    return %c0_i32, %arg0 : i32, i32
  }
  func.func @transform_1(%arg0: i32) -> (i32, i32) {
    %c0_i32 = arith.constant 0 : i32
    %c0_i32_0 = arith.constant 0 : i32
    return %c0_i32, %arg0 : i32, i32
  }
  func.func @transform_2(%arg0: i32) -> (i32, i32) {
    %c0_i32 = arith.constant 0 : i32
    %c0_i32_0 = arith.constant 0 : i32
    return %c0_i32, %arg0 : i32, i32
  }
  func.func @transform_3(%arg0: i32) -> (i32, i32) {
    %c0_i32 = arith.constant 0 : i32
    %c0_i32_0 = arith.constant 0 : i32
    return %c0_i32, %arg0 : i32, i32
  }
  func.func @transform_4(%arg0: i32) -> (i32, i32) {
    %c0_i32 = arith.constant 0 : i32
    %c0_i32_0 = arith.constant 0 : i32
    return %c0_i32, %arg0 : i32, i32
  }
}

</mosaic_0001>

<bundles_post_ra>
// kernel: tpu_custom_call.1
= control target key start
LH: loop header
LB: loop body
LE: loop exit
PB: predicated region body
PF: predicated region fallthrough
CT: control target
= control target key end

     0   :  { %10 = vsyncpa [#allocation3], 0  ;;  %s577_s0 = inlined_call_operand.hbm [shape: f32[48,256], index: 0, kind: input, shape index: {}]   ;;  %s578_s1 = inlined_call_operand.hbm [shape: f32[1,256], index: 1, kind: input, shape index: {}]   ;;  %s579_s2 = inlined_call_operand.vmem [shape: f32[1,256], index: 2, kind: input, shape index: {}]   ;;  %s580_s3 = inlined_call_operand.hbm [shape: f32[48,256], index: 3, kind: output, shape index: {0}]   ;;  %s581_s4 = inlined_call_operand.hbm [shape: f32[2,256], index: 4, kind: output, shape index: {1}]  }
   0x1   :  { %11 = vsyncpa [#allocation6], 0 }
   0x2   :  { %12 = vsyncpa [#allocation4], 0 }
   0x3   :  { %13 = vsyncpa [#allocation9], 0  ;;  %s421_s15 = smov [#allocation2]  }
   0x4   :  { %s19_s16 = sshll.u32 %s421_s15, 4  ;;  %s20_s16 = int_to_ptr.vmem [resolvable:$true] %s19_s16 }
   0x5   :  { %s341_s17 = scalar_lea.vmem %s20_s16, 1536  ;;  %p346_p1 = scmp.lt.s32.totalorder %s20_s16, %s20_s16 }
   0x6   :  { %p342_p0 = scmp.ne.s32.totalorder %s20_s16, %s341_s17  ;;  %p347_p2 = scmp.lt.s32.totalorder %s341_s17, %s341_s17 }
   0x8   :  { %p348_p3 = por %p347_p2, %p346_p1 }
   0xa   :  { %p349_p4 = pnand %p348_p3, %p342_p0 }
   0xc   :  { %352 = shalt.err (!%p349_p4)
}
   0xd   :  { %s422_s18 = smov 256   ;;  %s423_s19 = smov 16  }
   0xe   :  { %25 = dma.hbm_to_vmem [thread:$0]  %s577_s0, 1536, %s20_s16, [#allocation3], %s422_s18, %s422_s18, %s423_s19  }
   0xf   :  { %s424_s22 = smov [#allocation5]  }
  0x10   :  { %s32_s23 = sshll.u32 %s424_s22, 4  ;;  %s33_s23 = int_to_ptr.vmem [resolvable:$true] %s32_s23 }
  0x11   :  { %s361_s24 = scalar_lea.vmem %s33_s23, 32  ;;  %p366_p6 = scmp.lt.s32.totalorder %s33_s23, %s33_s23 }
  0x12   :  { %p362_p5 = scmp.ne.s32.totalorder %s33_s23, %s361_s24  ;;  %p367_p7 = scmp.lt.s32.totalorder %s361_s24, %s361_s24 }
  0x14   :  { %p368_p8 = por %p367_p7, %p366_p6 }
  0x16   :  { %p369_p9 = pnand %p368_p8, %p362_p5 }
  0x18   :  { %372 = shalt.err (!%p369_p9)
}
  0x19   :  { %35 = dma.hbm_to_vmem [thread:$0]  %s578_s1, 32, %s33_s23, [#allocation6]  }
  0x1a   :  { %413 = dma.done.wait [#allocation3], 1536  }
  0x1b   :  { %414 = vsyncadd [#allocation3], 4294965760 }
  0x1c   :  { %415 = dma.done.wait [#allocation6], 32  }
  0x1d   :  { %416 = vsyncadd [#allocation6], 4294967264  ;;  %v462_v0 = vld [vmem:[#allocation2] sm:$0xff]  ;;  %v464_v1 = vld [vmem:[#allocation2 + $0x8] sm:$0xff]  ;;  %v155_v32 = vlaneseq  ;;  %v425_v34 = vmov 1966171168  }
  0x1e   :  { %v466_v2 = vld [vmem:[#allocation2 + $0x10] sm:$0xff]  ;;  %v468_v3 = vld [vmem:[#allocation2 + $0x18] sm:$0xff]  ;;  %v470_v4 = vld [vmem:[#allocation2 + $0x20] sm:$0xff]  ;;  %v153_v35 = vunpack.c.l.s4 %v425_v34  ;;  %s426_s0 = smov [#allocation8]  }
  0x1f   :  { %v472_v5 = vld [vmem:[#allocation2 + $0x28] sm:$0xff]  ;;  %v56_v6 = vadd.f32 %v466_v2, %v462_v0  ;;  %v476_v7 = vld [vmem:[#allocation2 + $0x30] sm:$0xff]  ;;  %v67_v8 = vadd.f32 %v468_v3, %v464_v1  ;;  %v480_v9 = vld [vmem:[#allocation2 + $0x38] sm:$0xff]  ;;  %v502_v39 = vshrl.u32 %v155_v32, 7  ;;  %vm534_vm0 = vcmp.lt.s32.totalorder %v155_v32, 256  ;;  %s308_s1 = sshll.u32 %s426_s0, 4  ;;  %s309_s1 = int_to_ptr.vmem [resolvable:$true] %s308_s1 }
  0x20   :  { %v483_v11 = vld [vmem:[#allocation2 + $0x40] sm:$0xff]  ;;  %v486_v13 = vld [vmem:[#allocation2 + $0x48] sm:$0xff]  ;;  %v489_v15 = vld [vmem:[#allocation2 + $0x50] sm:$0xff]  ;;  %v154_v43 = vunpack.c.0.s8 %v153_v35  ;;  %s373_s27 = scalar_lea.vmem %s309_s1, 64  ;;  %p378_p11 = scmp.lt.s32.totalorder %s309_s1, %s309_s1 }
  0x21   :  { %v57_v10 = vadd.f32 %v56_v6, %v470_v4  ;;  %v68_v12 = vadd.f32 %v67_v8, %v472_v5  ;;  %v492_v17 = vld [vmem:[#allocation2 + $0x58] sm:$0xff]  ;;  %p374_p10 = scmp.ne.s32.totalorder %s309_s1, %s373_s27  ;;  %p379_p12 = scmp.lt.s32.totalorder %s373_s27, %s373_s27 }
  0x22   :  { %v529_v60 = vsub.s32 %v154_v43, %v502_v39 }
  0x23   :  { %v58_v14 = vadd.f32 %v57_v10, %v476_v7  ;;  %v69_v16 = vadd.f32 %v68_v12, %v480_v9  ;;  %p380_p13 = por %p379_p12, %p378_p11 }
  0x25   :  { %v59_v18 = vadd.f32 %v58_v14, %v483_v11  ;;  %v70_v19 = vadd.f32 %v69_v16, %v486_v13  ;;  %p381_p0 = pnand %p380_p13, %p374_p10 }
  0x27   :  { %v60_v20 = vadd.f32 %v59_v18, %v489_v15  ;;  %v71_v21 = vadd.f32 %v70_v19, %v492_v17 }
  0x29   :  { %v61_v22 = vrot.slane %v60_v20, 4  ;;  %v72_v23 = vrot.slane %v71_v21, 4 }
  0x2b   :  { %v62_v24 = vadd.f32 %v61_v22, %v60_v20  ;;  %v73_v25 = vadd.f32 %v72_v23, %v71_v21 }
  0x2d   :  { %v63_v26 = vrot.slane %v62_v24, 2  ;;  %v74_v27 = vrot.slane %v73_v25, 2 }
  0x2f   :  { %v64_v28 = vadd.f32 %v63_v26, %v62_v24  ;;  %v75_v29 = vadd.f32 %v74_v27, %v73_v25 }
  0x31   :  { %v65_v30 = vrot.slane %v64_v28, 1  ;;  %v76_v31 = vrot.slane %v75_v29, 1 }
  0x33   :  { %v66_v33 = vadd.f32 %v65_v30, %v64_v28  ;;  %v77_v36 = vadd.f32 %v76_v31, %v75_v29 }
  0x35   :  { %v498_v37 = vmul.f32 0.020833334, %v66_v33  ;;  %v500_v38 = vmul.f32 0.020833334, %v77_v36 }
  0x37   :  { %v81_v40 = vsub.f32 %v462_v0, %v498_v37  ;;  %v83_v41 = vsub.f32 %v466_v2, %v498_v37  ;;  %v85_v42 = vsub.f32 %v470_v4, %v498_v37  ;;  %v82_v44 = vsub.f32 %v464_v1, %v500_v38 }
  0x38   :  { %v84_v45 = vsub.f32 %v468_v3, %v500_v38  ;;  %v86_v46 = vsub.f32 %v472_v5, %v500_v38  ;;  %v87_v47 = vsub.f32 %v476_v7, %v498_v37  ;;  %v88_v48 = vsub.f32 %v480_v9, %v500_v38 }
  0x39   :  { %v89_v49 = vsub.f32 %v483_v11, %v498_v37  ;;  %v93_v50 = vmul.f32 %v81_v40, %v81_v40  ;;  %v94_v51 = vmul.f32 %v82_v44, %v82_v44  ;;  %v95_v52 = vmul.f32 %v83_v41, %v83_v41 }
  0x3a   :  { %v96_v53 = vmul.f32 %v84_v45, %v84_v45  ;;  %v90_v54 = vsub.f32 %v486_v13, %v500_v38  ;;  %v97_v55 = vmul.f32 %v85_v42, %v85_v42  ;;  %v98_v56 = vmul.f32 %v86_v46, %v86_v46 }
  0x3b   :  { %v91_v57 = vsub.f32 %v489_v15, %v498_v37  ;;  %v92_v58 = vsub.f32 %v492_v17, %v500_v38  ;;  %v99_v59 = vmul.f32 %v87_v47, %v87_v47  ;;  %v100_v61 = vmul.f32 %v88_v48, %v88_v48 }
  0x3c   :  { %v105_v62 = vadd.f32 %v95_v52, %v93_v50  ;;  %v116_v63 = vadd.f32 %v96_v53, %v94_v51  ;;  %v249_v6 = vcombine.low %v498_v37, %v500_v38  ;;  %v101_v8 = vmul.f32 %v89_v49, %v89_v49 }
  0x3d   :  { %v102_v10 = vmul.f32 %v90_v54, %v90_v54  ;;  %v103_v18 = vmul.f32 %v91_v57, %v91_v57  ;;  %v104_v20 = vmul.f32 %v92_v58, %v92_v58  ;;  %v147_v58 = vld [vmem:[#allocation5] sm:$0x3] }
  0x3e   :  { %v106_v12 = vadd.f32 %v105_v62, %v97_v55  ;;  %v117_v14 = vadd.f32 %v116_v63, %v98_v56  ;;  %v256_v16 = vrot.slane %v249_v6, %v529_v60  ;;  %v171_v62 = vsub.s32 0, %v502_v39 }
  0x3f   :  { %v175_v63 = vsub.s32 1, %v502_v39 }
  0x40   :  { %v107_v21 = vadd.f32 %v106_v12, %v99_v59  ;;  %v118_v22 = vadd.f32 %v117_v14, %v100_v61  ;;  %v263_v23 = vrot.slane %v256_v16, %v529_v60 }
  0x42   :  { %v108_v24 = vadd.f32 %v107_v21, %v101_v8  ;;  %v119_v25 = vadd.f32 %v118_v22, %v102_v10  ;;  %269 = vst.msk [vmem:[#allocation8] ss:$2 sm:$0x3] %vm534_vm0, %v263_v23 }
  0x44   :  { %v109_v26 = vadd.f32 %v108_v24, %v103_v18  ;;  %v120_v27 = vadd.f32 %v119_v25, %v104_v20 }
  0x46   :  { %v110_v28 = vrot.slane %v109_v26, 4  ;;  %v121_v29 = vrot.slane %v120_v27, 4 }
  0x48   :  { %v111_v30 = vadd.f32 %v110_v28, %v109_v26  ;;  %v122_v31 = vadd.f32 %v121_v29, %v120_v27 }
  0x4a   :  { %v112_v32 = vrot.slane %v111_v30, 2  ;;  %v123_v33 = vrot.slane %v122_v31, 2 }
  0x4c   :  { %v113_v34 = vadd.f32 %v112_v32, %v111_v30  ;;  %v124_v35 = vadd.f32 %v123_v33, %v122_v31 }
  0x4e   :  { %v114_v36 = vrot.slane %v113_v34, 1  ;;  %v125_v40 = vrot.slane %v124_v35, 1 }
  0x50   :  { %v115_v41 = vadd.f32 %v114_v36, %v113_v34  ;;  %v126_v42 = vadd.f32 %v125_v40, %v124_v35 }
  0x52   :  { %v127_v43 = vmul.f32 0.020833334, %v115_v41  ;;  %v128_v44 = vmul.f32 0.020833334, %v126_v42 }
  0x54   :  { %v129_v45 = vadd.f32 1e-05, %v127_v43  ;;  %v130_v46 = vadd.f32 1e-05, %v128_v44 }
  0x56   :  { %329 = vrsqrt.f32 %v129_v45  ;;  %vm133_vm1 = vcmp.eq.f32.partialorder %v129_v45, inf  ;;  %v136_v48 = vand.u32 2147483648, %v129_v45  ;;  %vm135_vm2 = vcmp.eq.f32.partialorder %v129_v45, 0.0 }
  0x57   :  { %331 = vrsqrt.f32 %v130_v46  ;;  %vm140_vm3 = vcmp.eq.f32.partialorder %v130_v46, inf  ;;  %v143_v51 = vand.u32 2147483648, %v130_v46  ;;  %vm142_vm4 = vcmp.eq.f32.partialorder %v130_v46, 0.0 }
  0x63   :  { %v330_v47 = vpop.eup %329 }
  0x64   :  { %v332_v49 = vpop.eup %331  ;;  %v132_v50 = vmul.f32 %v330_v47, %v129_v45 }
  0x65   :  { %v151_v52 = vcombine.low %v330_v47, %v332_v49  ;;  %v139_v53 = vmul.f32 %v332_v49, %v130_v46 }
  0x66   :  { %v134_v54 = vsel %vm133_vm1, %v129_v45, %v132_v50 }
  0x67   :  { %v158_v55 = vrot.slane %v151_v52, %v529_v60  ;;  %v137_v56 = vsel %vm135_vm2, %v136_v48, %v134_v54  ;;  %v141_v57 = vsel %vm140_vm3, %v130_v46, %v139_v53 }
  0x68   :  { %v144_v59 = vsel %vm142_vm4, %v143_v51, %v141_v57 }
  0x69   :  { %v165_v61 = vrot.slane %v158_v55, %v529_v60  ;;  %v272_v6 = vcombine.low %v137_v56, %v144_v59 }
  0x6b   :  { %v167_v8 = vmul.f32 %v165_v61, %v147_v58  ;;  %v279_v10 = vrot.slane %v272_v6, %v529_v60 }
  0x6d   :  { %v172_v12 = vrot.slane %v167_v8, %v171_v62  ;;  %v176_v14 = vrot.slane %v167_v8, %v175_v63  ;;  %v286_v16 = vrot.slane %v279_v10, %v529_v60 }
  0x6f   :  { %v179_v18 = vmul.f32 %v172_v12, %v498_v37  ;;  %v180_v20 = vmul.f32 %v176_v14, %v500_v38  ;;  %289 = vst.msk [vmem:[#allocation8 + $0x1] ss:$2 sm:$0x3] %vm534_vm0, %v286_v16 }
  0x70   :  { %384 = shalt.err (!%p381_p0)
}
  0x71   :  { %311 = dma.vmem_to_hbm [thread:$0]  %s309_s1, 64, %s581_s4, [#allocation9]   ;;  %v183_v39 = vcombine.low %v179_v18, %v180_v20  ;;  %v148_v37 = vld [vmem:[%s579_s2] sm:$0x3]  ;;  %v200_v19 = vmul.f32 %v172_v12, %v462_v0  ;;  %v201_v22 = vmul.f32 %v176_v14, %v464_v1  ;;  %v202_v23 = vmul.f32 %v172_v12, %v466_v2 }
  0x72   :  { %v203_v25 = vmul.f32 %v176_v14, %v468_v3  ;;  %v204_v26 = vmul.f32 %v172_v12, %v470_v4  ;;  %v205_v27 = vmul.f32 %v176_v14, %v472_v5  ;;  %v206_v28 = vmul.f32 %v172_v12, %v476_v7  ;;  %s427_s2 = smov [#allocation7]  }
  0x73   :  { %v190_v21 = vrot.slane %v183_v39, %v529_v60  ;;  %v207_v29 = vmul.f32 %v176_v14, %v480_v9  ;;  %v208_v30 = vmul.f32 %v172_v12, %v483_v11  ;;  %v210_v1 = vmul.f32 %v172_v12, %v489_v15  ;;  %s295_s4 = sshll.u32 %s427_s2, 4  ;;  %s296_s4 = int_to_ptr.vmem [resolvable:$true] %s295_s4 }
  0x74   :  { %v211_v2 = vmul.f32 %v176_v14, %v492_v17  ;;  %s393_s6 = scalar_lea.vmem %s296_s4, 1536  ;;  %p398_p2 = scmp.lt.s32.totalorder %s296_s4, %s296_s4 }
  0x75   :  { %v197_v38 = vrot.slane %v190_v21, %v529_v60  ;;  %v209_v60 = vmul.f32 %v176_v14, %v486_v13  ;;  %p394_p1 = scmp.ne.s32.totalorder %s296_s4, %s393_s6  ;;  %p399_p3 = scmp.lt.s32.totalorder %s393_s6, %s393_s6 }
  0x77   :  { %v199_v24 = vsub.f32 %v148_v37, %v197_v38  ;;  %p400_p4 = por %p399_p3, %p398_p2 }
  0x79   :  { %v216_v0 = vrot.slane %v199_v24, %v171_v62  ;;  %v220_v31 = vrot.slane %v199_v24, %v175_v63  ;;  %p401_p5 = pnand %p400_p4, %p394_p1 }
  0x7b   :  { %v223_v3 = vadd.f32 %v216_v0, %v200_v19  ;;  %v224_v4 = vadd.f32 %v220_v31, %v201_v22  ;;  %v225_v32 = vadd.f32 %v216_v0, %v202_v23  ;;  %v226_v5 = vadd.f32 %v220_v31, %v203_v25 }
  0x7c   :  { %v227_v33 = vadd.f32 %v216_v0, %v204_v26  ;;  %v228_v7 = vadd.f32 %v220_v31, %v205_v27  ;;  %v229_v34 = vadd.f32 %v216_v0, %v206_v28  ;;  %v230_v9 = vadd.f32 %v220_v31, %v207_v29 }
  0x7d   :  { %235 = vst [vmem:[#allocation7] sm:$0xff] %v223_v3  ;;  %236 = vst [vmem:[#allocation7 + $0x8] sm:$0xff] %v224_v4  ;;  %v231_v11 = vadd.f32 %v216_v0, %v208_v30  ;;  %v232_v13 = vadd.f32 %v220_v31, %v209_v60  ;;  %v233_v35 = vadd.f32 %v216_v0, %v210_v1 }
  0x7e   :  { %237 = vst [vmem:[#allocation7 + $0x10] sm:$0xff] %v225_v32  ;;  %238 = vst [vmem:[#allocation7 + $0x18] sm:$0xff] %v226_v5  ;;  %v234_v15 = vadd.f32 %v220_v31, %v211_v2 }
  0x7f   :  { %239 = vst [vmem:[#allocation7 + $0x20] sm:$0xff] %v227_v33  ;;  %240 = vst [vmem:[#allocation7 + $0x28] sm:$0xff] %v228_v7 }
  0x80   :  { %241 = vst [vmem:[#allocation7 + $0x30] sm:$0xff] %v229_v34  ;;  %242 = vst [vmem:[#allocation7 + $0x38] sm:$0xff] %v230_v9 }
  0x81   :  { %243 = vst [vmem:[#allocation7 + $0x40] sm:$0xff] %v231_v11  ;;  %244 = vst [vmem:[#allocation7 + $0x48] sm:$0xff] %v232_v13 }
  0x82   :  { %245 = vst [vmem:[#allocation7 + $0x50] sm:$0xff] %v233_v35  ;;  %246 = vst [vmem:[#allocation7 + $0x58] sm:$0xff] %v234_v15 }
  0x83   :  { %404 = shalt.err (!%p401_p5)
}
  0x84   :  { %301 = dma.vmem_to_hbm [thread:$0]  %s296_s4, 1536, %s580_s3, [#allocation4], %s422_s18, %s422_s18, %s423_s19  }
  0x85   :  { %417 = dma.done.wait [#allocation4], 1536  }
  0x86   :  { %418 = vsyncadd [#allocation4], 4294965760 }
  0x87   :  { %419 = dma.done.wait [#allocation9], 64  }
  0x88   :  { %420 = vsyncadd [#allocation9], 4294967232 }
  0x89   :  { %318 = vsyncpa [#allocation3], 1 }
  0x8a   :  { %319 = vsyncpa [#allocation6], 1 }
  0x8b   :  { %320 = vsyncpa [#allocation4], 1 }
  0x8c   :  { %321 = vsyncpa [#allocation9], 1 }

</bundles_post_ra>
